<compile_context>
chip_gen: v6e
topology: v6e:2x2x1
jax: 0.10.0
libtpu: 0.0.40
codegen_flags: <defaults>
</compile_context>

<pallas_src>
import jax
import jax.numpy as jnp
from jax.experimental import pallas as pl
from jax.experimental.pallas import tpu as pltpu


def _list_dense_kernel(slab_ref, o_ref):
    # Slab layout (rows):
    #   0      : x            (1, 4)
    #   1..4   : w0^T         (4, 4)
    #   5..8   : w1           (4, 4)
    #   9..12  : w2^T         (4, 4)
    #   13..16 : w3 broadcast (4, 4)  (only column 0 is meaningful)
    x = slab_ref[0:1, :]          # (1, 4)
    w0t = slab_ref[1:5, :]        # (4, 4) = w0^T
    w1 = slab_ref[5:9, :]         # (4, 4)
    w2t = slab_ref[9:13, :]       # (4, 4) = w2^T
    w3 = slab_ref[13:17, :][:, 0:1]  # (4, 1)

    # (((x @ w0) @ w1) @ w2) @ w3, left-to-right exactly like the torch loop.
    # Alternating row/column intermediates keep every reduce on the axis the
    # operands already live on (lanes or sublanes), so no transposes and no
    # MXU push/pop latency — pure VPU multiplies + tiny XLU reduces.
    h0 = jnp.sum(w0t * x, axis=1, keepdims=True)    # (4, 1) = (x @ w0)^T
    h1 = jnp.sum(w1 * h0, axis=0, keepdims=True)    # (1, 4) = x @ w0 @ w1
    h2 = jnp.sum(w2t * h1, axis=1, keepdims=True)   # (4, 1) = (x @ w0 @ w1 @ w2)^T
    o_ref[...] = jnp.sum(w3 * h2, axis=0, keepdims=True)  # (1, 1)


def my_list_dense(x, w0, w1, w2, w3):
    """Forward pass of MyListDense: (((x @ w0) @ w1) @ w2) @ w3."""
    # Pack everything into one slab so the kernel issues a single input DMA.
    # This is layout plumbing only — all arithmetic happens inside the kernel.
    slab = jnp.concatenate(
        [
            x.astype(jnp.float32),            # row 0
            w0.T.astype(jnp.float32),         # rows 1..4
            w1.astype(jnp.float32),           # rows 5..8
            w2.T.astype(jnp.float32),         # rows 9..12
            jnp.broadcast_to(w3.astype(jnp.float32), (4, 4)),  # rows 13..16
        ],
        axis=0,
    )  # (17, 4) f32

    return pl.pallas_call(
        _list_dense_kernel,
        out_shape=jax.ShapeDtypeStruct((1, 1), jnp.float32),
        in_specs=[pl.BlockSpec(memory_space=pltpu.MemorySpace.VMEM)],
        out_specs=pl.BlockSpec(memory_space=pltpu.MemorySpace.VMEM),
    )(slab)


if __name__ == "__main__":
    key = jax.random.PRNGKey(0)
    k0, k1, k2, k3 = jax.random.split(key, 4)

    # Deterministic parameter init matching the torch.randn shapes in __init__.
    w0 = jax.random.normal(k0, (4, 4), dtype=jnp.float32)
    w1 = jax.random.normal(k1, (4, 4), dtype=jnp.float32)
    w2 = jax.random.normal(k2, (4, 4), dtype=jnp.float32)
    w3 = jax.random.normal(k3, (4, 1), dtype=jnp.float32)

    # Input matching the reference script: x = torch.ones(1, 4)
    x = jnp.ones((1, 4), dtype=jnp.float32)

    out = jax.block_until_ready(jax.jit(my_list_dense)(x, w0, w1, w2, w3))

    # Pure-JAX reference, same left-to-right association as the torch loop.
    ref = ((x @ w0) @ w1) @ w2 @ w3
    assert out.shape == (1, 1)
    assert jnp.allclose(out, ref, rtol=1e-4, atol=1e-5)

    print("KERNEL_OK")
</pallas_src>

<mosaic_0001>
module attributes {stable_mosaic.version = 11 : i64} {
  func.func @_list_dense_kernel(%arg0: memref<17x4xf32, #tpu.memory_space<vmem>>, %arg1: memref<1x1xf32, #tpu.memory_space<vmem>>) attributes {dimension_semantics = [], scalar_prefetch = 0 : i64, scratch_operands = 0 : i64, tpu.core_type = #tpu.core_type<tc>} {
    %c0 = arith.constant 0 : index
    %c0_0 = arith.constant 0 : index
    %0 = vector.load %arg0[%c0, %c0_0] : memref<17x4xf32, #tpu.memory_space<vmem>>, vector<1x4xf32>
    %c1 = arith.constant 1 : index
    %c0_1 = arith.constant 0 : index
    %1 = vector.load %arg0[%c1, %c0_1] : memref<17x4xf32, #tpu.memory_space<vmem>>, vector<4x4xf32>
    %c5 = arith.constant 5 : index
    %c0_2 = arith.constant 0 : index
    %2 = vector.load %arg0[%c5, %c0_2] : memref<17x4xf32, #tpu.memory_space<vmem>>, vector<4x4xf32>
    %c9 = arith.constant 9 : index
    %c0_3 = arith.constant 0 : index
    %3 = vector.load %arg0[%c9, %c0_3] : memref<17x4xf32, #tpu.memory_space<vmem>>, vector<4x4xf32>
    %c13 = arith.constant 13 : index
    %c0_4 = arith.constant 0 : index
    %4 = vector.load %arg0[%c13, %c0_4] : memref<17x4xf32, #tpu.memory_space<vmem>>, vector<4x4xf32>
    %5 = vector.extract_strided_slice %4 {offsets = [0, 0], sizes = [4, 1], strides = [1, 1]} : vector<4x4xf32> to vector<4x1xf32>
    %6 = vector.broadcast %0 : vector<1x4xf32> to vector<4x4xf32>
    %7 = arith.mulf %1, %6 : vector<4x4xf32>
    %cst = arith.constant dense<0.000000e+00> : vector<4xf32>
    %8 = vector.multi_reduction <add>, %7, %cst [1] : vector<4x4xf32> to vector<4xf32>
    %9 = vector.shape_cast %8 : vector<4xf32> to vector<4x1xf32>
    %10 = vector.broadcast %9 : vector<4x1xf32> to vector<4x4xf32>
    %11 = arith.mulf %2, %10 : vector<4x4xf32>
    %cst_5 = arith.constant dense<0.000000e+00> : vector<4xf32>
    %12 = vector.multi_reduction <add>, %11, %cst_5 [0] : vector<4x4xf32> to vector<4xf32>
    %13 = vector.shape_cast %12 : vector<4xf32> to vector<1x4xf32>
    %14 = vector.broadcast %13 : vector<1x4xf32> to vector<4x4xf32>
    %15 = arith.mulf %3, %14 : vector<4x4xf32>
    %cst_6 = arith.constant dense<0.000000e+00> : vector<4xf32>
    %16 = vector.multi_reduction <add>, %15, %cst_6 [1] : vector<4x4xf32> to vector<4xf32>
    %17 = vector.shape_cast %16 : vector<4xf32> to vector<4x1xf32>
    %18 = arith.mulf %5, %17 : vector<4x1xf32>
    %cst_7 = arith.constant dense<0.000000e+00> : vector<1xf32>
    %19 = vector.multi_reduction <add>, %18, %cst_7 [0] : vector<4x1xf32> to vector<1xf32>
    %20 = vector.shape_cast %19 : vector<1xf32> to vector<1x1xf32>
    %c0_8 = arith.constant 0 : index
    %c0_9 = arith.constant 0 : index
    %21 = vector.load %arg1[%c0_8, %c0_9] : memref<1x1xf32, #tpu.memory_space<vmem>>, vector<1x1xf32>
    tpu.vector_store %arg1[%c0_8, %c0_9], %20 {strides = array<i32>} : memref<1x1xf32, #tpu.memory_space<vmem>>, vector<1x1xf32>,
    return
  }
}

</mosaic_0001>

<bundles_post_ra>
// kernel: my_list_dense.1
= control target key start
LH: loop header
LB: loop body
LE: loop exit
PB: predicated region body
PF: predicated region fallthrough
CT: control target
= control target key end

     0   :  { %vm19_vm0 = vcmask 27648   ;;  %s116_s0 = inlined_call_operand.vmem [shape: f32[17,4], index: 0, kind: input, shape index: {}]   ;;  %s117_s1 = inlined_call_operand.hbm [shape: f32[1,1], index: 1, kind: output, shape index: {}]  }
   0x1   :  { %v60_v0 = vld [vmem:[%s116_s0] ss:$0 sm:$0xff]  ;;  %v10_v1 = vld [vmem:[%s116_s0 + $0x1] sm:$0xf] }
   0x2   :  { %v18_v2 = vmul.f32 %v60_v0, %v10_v1 }
   0x3   :  { %6 = vsyncpa [#allocation3], 0  ;;  %v11_v4 = vld [vmem:[%s116_s0 + $0x5] sm:$0xf]  ;;  %v12_v13 = vld [vmem:[%s116_s0 + $0x9] sm:$0xf] }
   0x4   :  { %v20_v3 = vsel %vm19_vm0, %v18_v2, 0.0  ;;  %v13_v17 = vld [vmem:[%s116_s0 + $0xd] sm:$0xf]  ;;  %vm36_vm1 = vcmask 3072   ;;  %s84_s16 = smov [#allocation2]   ;;  %vm44_vm2 = vcmask 0  }
   0x5   :  { %21 = vadd.xlane.f32.xlu0 %v20_v3  ;;  %s52_s17 = sshll.u32 %s84_s16, 4  ;;  %s53_s17 = int_to_ptr.vmem [resolvable:$true] %s52_s17 }
   0x6   :  { %s62_s18 = scalar_lea.vmem %s53_s17, 16  ;;  %s66_s19 = scalar_lea.vmem %s53_s17, 32 }
   0x7   :  { %p63_p0 = scmp.ne.s32.totalorder %s53_s17, %s62_s18  ;;  %p67_p1 = scmp.lt.s32.totalorder %s53_s17, %s53_s17 }
   0x8   :  { %p68_p2 = scmp.lt.s32.totalorder %s66_s19, %s62_s18 }
   0xa   :  { %p69_p3 = por %p68_p2, %p67_p1 }
   0xc   :  { %p70_p4 = pnand %p69_p3, %p63_p0 }
  0x8e   :  { %v22_v5 = vpop.xlane.xlu0 %21 }
  0x8f   :  { %v23_v6 = vmul.f32 %v22_v5, %v11_v4 }
  0x91   :  { %v24_v7 = vsel %vm19_vm0, %v23_v6, 0.0 }
  0x92   :  { %v25_v8 = vrot.slane %v24_v7, 4 }
  0x94   :  { %v26_v9 = vadd.f32 %v25_v8, %v24_v7 }
  0x96   :  { %v27_v10 = vrot.slane %v26_v9, 2 }
  0x98   :  { %v28_v11 = vadd.f32 %v27_v10, %v26_v9 }
  0x9a   :  { %v29_v12 = vrot.slane %v28_v11, 1 }
  0x9c   :  { %v30_v14 = vadd.f32 %v29_v12, %v28_v11 }
  0x9e   :  { %v31_v15 = vmul.f32 %v30_v14, %v12_v13 }
  0xa0   :  { %v32_v16 = vsel %vm19_vm0, %v31_v15, 0.0 }
  0xa1   :  { %33 = vadd.xlane.f32.xlu0 %v32_v16 }
 0x12a   :  { %v34_v18 = vpop.xlane.xlu0 %33 }
 0x12b   :  { %v35_v19 = vmul.f32 %v34_v18, %v13_v17 }
 0x12d   :  { %v37_v20 = vsel %vm36_vm1, %v35_v19, 0.0 }
 0x12e   :  { %v38_v21 = vrot.slane %v37_v20, 4 }
 0x130   :  { %v39_v22 = vadd.f32 %v38_v21, %v37_v20 }
 0x132   :  { %v40_v23 = vrot.slane %v39_v22, 2 }
 0x134   :  { %v41_v24 = vadd.f32 %v40_v23, %v39_v22 }
 0x136   :  { %v42_v25 = vrot.slane %v41_v24, 1 }
 0x138   :  { %v43_v26 = vadd.f32 %v42_v25, %v41_v24 }
 0x13a   :  { %45 = vst.msk [vmem:[#allocation2] sm:$0x1] %vm44_vm2, %v43_v26 }
 0x13b   :  { %73 = shalt.err (!%p70_p4)
}
 0x13c   :  { %55 = dma.vmem_to_hbm [thread:$0]  %s53_s17, 16, %s117_s1, [#allocation3]  }
 0x13d   :  { %82 = dma.done.wait [#allocation3], 16  }
 0x13e   :  { %83 = vsyncadd [#allocation3], 4294967280 }
 0x13f   :  { %59 = vsyncpa [#allocation3], 1 }

</bundles_post_ra>
